<compile_context>
chip_gen: v7x
topology: tpu7x:2x2x1
jax: 0.10.0
libtpu: 0.0.40
codegen_flags: <defaults>
</compile_context>

<pallas_src>
import jax
import jax.numpy as jnp
from jax.experimental import pallas as pl
from jax.experimental.pallas import tpu as pltpu


def _round_up(x: int, m: int) -> int:
    return ((x + m - 1) // m) * m


def _round_down(x: int, m: int) -> int:
    return (x // m) * m


def _vmem_capacity_bytes() -> int:
    # Per-TensorCore VMEM.  Conservative fallback = v7x (64 MiB).
    try:
        return int(pltpu.get_tpu_info().vmem_capacity_bytes)
    except Exception:
        return 64 << 20


# ----------------------------------------------------------------------------
# Kernels
# ----------------------------------------------------------------------------
def _fused_kernel(x_ref, w1_ref, b1_ref, w2_ref, b2_ref, o_ref):
    """Both layers fused; W1/W2/b1/b2 fully resident in VMEM."""
    cdt = w1_ref.dtype
    # fc1 + relu: MXU matmul with f32 accumulation; bias/relu in f32 (VPU).
    h = jnp.dot(x_ref[...].astype(cdt), w1_ref[...],
                preferred_element_type=jnp.float32)
    h = jnp.maximum(h + b1_ref[...], 0.0)
    # fc2 + relu.
    o = jnp.dot(h.astype(cdt), w2_ref[...], preferred_element_type=jnp.float32)
    o = jnp.maximum(o + b2_ref[...], 0.0)
    o_ref[...] = o.astype(o_ref.dtype)


def _ntiled_kernel(x_ref, w1_ref, b1_ref, w2_ref, b2_ref, o_ref, h_ref):
    """fc2 output dim tiled on grid axis 1; h computed once per batch tile."""
    j = pl.program_id(1)
    cdt = w1_ref.dtype

    @pl.when(j == 0)
    def _():
        h = jnp.dot(x_ref[...].astype(cdt), w1_ref[...],
                    preferred_element_type=jnp.float32)
        h = jnp.maximum(h + b1_ref[...], 0.0)
        h_ref[...] = h.astype(h_ref.dtype)

    o = jnp.dot(h_ref[...], w2_ref[...], preferred_element_type=jnp.float32)
    o = jnp.maximum(o + b2_ref[...], 0.0)
    o_ref[...] = o.astype(o_ref.dtype)


# ----------------------------------------------------------------------------
# Wrapper
# ----------------------------------------------------------------------------
def preprocess(x, w1_t, b1, w2_t, b2, *,
               compute_dtype=jnp.bfloat16, block_b=None, n_block=None):
    """Fused two-layer MLP with ReLU.

    x    : (B, input_size)             (passed to the kernel unpadded/uncast)
    w1_t : (input_size, P)  fc1 weight, pre-transposed to (in, out)
    b1   : (P,) or (1, P)
    w2_t : (P, P)           fc2 weight, pre-transposed
    b2   : (P,) or (1, P)
    compute_dtype : MXU input dtype (default bf16; accumulation stays f32).
    block_b       : force a batch tile size (rows).  Default: auto from bytes.
    n_block       : force fc2 N-tiling with this tile width (multiple of 128).
                    Default: auto (only used when W2 would not fit VMEM).
    """
    B, D_in = x.shape
    P = w1_t.shape[1]
    out_dtype = x.dtype
    cdtype = jnp.dtype(compute_dtype)
    csize = cdtype.itemsize
    x_item = jnp.dtype(x.dtype).itemsize
    out_item = jnp.dtype(out_dtype).itemsize

    # Lane-dense fc output width only when P isn't already a 128 multiple.
    Pp = P if P % 128 == 0 else _round_up(P, 128)

    # Host-side prep touches only the small parameters; x is left untouched.
    w1p = jnp.asarray(w1_t, cdtype)
    w2p = jnp.asarray(w2_t, cdtype)
    b1p = jnp.asarray(b1, jnp.float32).reshape(1, P)
    b2p = jnp.asarray(b2, jnp.float32).reshape(1, P)
    if Pp != P:
        w1p = jnp.pad(w1p, ((0, 0), (0, Pp - P)))
        w2p = jnp.pad(w2p, ((0, Pp - P), (0, Pp - P)))
        b1p = jnp.pad(b1p, ((0, 0), (0, Pp - P)))
        b2p = jnp.pad(b2p, ((0, 0), (0, Pp - P)))

    vmem_cap = _vmem_capacity_bytes()
    budget = int(0.85 * vmem_cap)

    # Choose the path: keep W2 fully resident unless it would eat >1/4 of VMEM.
    use_ntiled = (n_block is not None) or (Pp * Pp * csize > vmem_cap // 4)

    if use_ntiled:
        bn = int(n_block) if n_block is not None else 512
        bn = max(128, _round_down(min(bn, Pp), 128))
        # Keep the double-buffered W2 slab within ~1/4 of VMEM.
        while bn > 128 and 2 * Pp * bn * csize > vmem_cap // 4:
            bn -= 128
        # Resident: W1, b1; streamed: W2/b2 slabs (double-buffered).
        resident = D_in * Pp * csize + Pp * 4 + 2 * Pp * bn * csize + 2 * bn * 4
        # Per-row VMEM: x/out tiles (double-buffered), x cast, h scratch
        # (cdtype), f32 h at j==0, f32 fc2 tile before the cast.
        per_row = (2 * D_in * x_item + 2 * bn * out_item
                   + D_in * csize + Pp * csize + Pp * 4 + bn * 4)
        stream_row = D_in * x_item + bn * out_item
    else:
        bn = Pp
        resident = D_in * Pp * csize + Pp * Pp * csize + 2 * Pp * 4
        # x/out tiles (double-buffered) + x cast + h cast + 2x f32 temporaries.
        per_row = (2 * D_in * x_item + 2 * Pp * out_item
                   + D_in * csize + Pp * csize + 2 * Pp * 4)
        stream_row = D_in * x_item + Pp * out_item

    # Batch tile: ~4 MiB of streamed bytes per grid step, capped by what VMEM
    # allows after the resident weights, never more than the (rounded) batch.
    if block_b is None:
        bb = max(256, (4 << 20) // max(stream_row, 1))
    else:
        bb = int(block_b)
    bb_cap = max((budget - resident) // max(per_row, 1), 8)
    bb = min(bb, bb_cap, _round_up(B, 8))
    bb = max(8, _round_down(bb, 8))

    vmem_need = resident + bb * per_row
    vmem_limit = min(int(vmem_need * 1.2) + (4 << 20), int(0.9 * vmem_cap))
    vmem_limit = max(vmem_limit, min(16 << 20, int(0.9 * vmem_cap)))

    flops = 2 * B * D_in * Pp + 2 * B * Pp * Pp
    bytes_accessed = (B * D_in * x_item + (D_in * Pp + Pp * Pp) * csize
                      + 2 * Pp * 4 + B * Pp * out_item)
    cost = pl.CostEstimate(flops=int(flops), transcendentals=0,
                           bytes_accessed=int(bytes_accessed))

    # Whole-array VMEM residency: DMA'd once, single-buffered by construction.
    vmem_full = pl.BlockSpec(memory_space=pltpu.MemorySpace.VMEM)

    if not use_ntiled:
        out = pl.pallas_call(
            _fused_kernel,
            out_shape=jax.ShapeDtypeStruct((B, Pp), out_dtype),
            grid_spec=pltpu.PrefetchScalarGridSpec(
                num_scalar_prefetch=0,
                grid=(pl.cdiv(B, bb),),
                in_specs=[
                    pl.BlockSpec((bb, D_in), lambda i: (i, 0)),  # x (pipelined)
                    vmem_full,                                   # W1 resident
                    vmem_full,                                   # b1 resident
                    vmem_full,                                   # W2 resident
                    vmem_full,                                   # b2 resident
                ],
                out_specs=pl.BlockSpec((bb, Pp), lambda i: (i, 0)),
            ),
            compiler_params=pltpu.CompilerParams(
                dimension_semantics=("parallel",),   # megacore-shard batch
                vmem_limit_bytes=int(vmem_limit),
            ),
            cost_estimate=cost,
        )(x, w1p, b1p, w2p, b2p)
    else:
        out = pl.pallas_call(
            _ntiled_kernel,
            out_shape=jax.ShapeDtypeStruct((B, Pp), out_dtype),
            grid_spec=pltpu.PrefetchScalarGridSpec(
                num_scalar_prefetch=0,
                grid=(pl.cdiv(B, bb), pl.cdiv(Pp, bn)),
                in_specs=[
                    pl.BlockSpec((bb, D_in), lambda i, j: (i, 0)),  # x
                    vmem_full,                                      # W1 resident
                    vmem_full,                                      # b1 resident
                    pl.BlockSpec((Pp, bn), lambda i, j: (0, j)),    # W2 slab
                    pl.BlockSpec((1, bn), lambda i, j: (0, j)),     # b2 slab
                ],
                out_specs=pl.BlockSpec((bb, bn), lambda i, j: (i, j)),
                scratch_shapes=[pltpu.VMEM((bb, Pp), cdtype)],      # h
            ),
            compiler_params=pltpu.CompilerParams(
                dimension_semantics=("parallel", "arbitrary"),
                vmem_limit_bytes=int(vmem_limit),
            ),
            cost_estimate=cost,
        )(x, w1p, b1p, w2p, b2p)

    return out if Pp == P else out[:, :P]


def preprocess_reference(x, w1_t, b1, w2_t, b2):
    h = jnp.maximum(x @ w1_t + jnp.reshape(b1, (1, -1)), 0.0)
    return jnp.maximum(h @ w2_t + jnp.reshape(b2, (1, -1)), 0.0)


def _reference_bf16(x, w1_t, b1, w2_t, b2):
    bf = lambda a: a.astype(jnp.bfloat16).astype(jnp.float32)
    h = jnp.maximum(bf(x) @ bf(w1_t) + jnp.reshape(b1, (1, -1)), 0.0)
    return jnp.maximum(bf(h) @ bf(w2_t) + jnp.reshape(b2, (1, -1)), 0.0)


if __name__ == "__main__":
    key = jax.random.PRNGKey(0)

    def make_params(k, d_in, d_out):
        kw, kb = jax.random.split(k)
        bound = 1.0 / (d_in ** 0.5)
        w = jax.random.uniform(kw, (d_out, d_in), minval=-bound, maxval=bound,
                               dtype=jnp.float32)
        b = jax.random.uniform(kb, (1, d_out), minval=-bound, maxval=bound,
                               dtype=jnp.float32)
        return w.T, b   # pre-transposed to (in, out)

    # ---- Test 1: module-sized shapes, default bf16 compute -----------------
    batch, input_size, processed = 16, 32, 32
    k_x, k1, k2, key = jax.random.split(key, 4)
    x = jax.random.normal(k_x, (batch, input_size), dtype=jnp.float32)
    w1_t, b1 = make_params(k1, input_size, processed)
    w2_t, b2 = make_params(k2, processed, processed)

    out_bf16 = jax.block_until_ready(preprocess(x, w1_t, b1, w2_t, b2))
    assert out_bf16.shape == (batch, processed)
    ref_bf16 = _reference_bf16(x, w1_t, b1, w2_t, b2)
    assert jnp.allclose(out_bf16, ref_bf16, atol=5e-2, rtol=5e-2), \
        "bf16 path mismatch vs bf16 reference"

    # ---- Test 2: same shapes, f32 compute -> exact check -------------------
    out_f32 = jax.block_until_ready(
        preprocess(x, w1_t, b1, w2_t, b2, compute_dtype=jnp.float32))
    ref_f32 = preprocess_reference(x, w1_t, b1, w2_t, b2)
    assert jnp.allclose(out_f32, ref_f32, atol=1e-5, rtol=1e-5), \
        "f32 path mismatch vs reference"

    # ---- Test 3: ragged batch + forced fc2 N-tiling (large-P path) ---------
    B2, D2, P2 = 100, 96, 256
    k_x2, k3, k4, key = jax.random.split(key, 4)
    x2 = jax.random.normal(k_x2, (B2, D2), dtype=jnp.float32)
    w1_t2, b1_2 = make_params(k3, D2, P2)
    w2_t2, b2_2 = make_params(k4, P2, P2)
    out2 = jax.block_until_ready(
        preprocess(x2, w1_t2, b1_2, w2_t2, b2_2,
                   compute_dtype=jnp.float32, block_b=32, n_block=128))
    ref2 = preprocess_reference(x2, w1_t2, b1_2, w2_t2, b2_2)
    assert out2.shape == (B2, P2)
    assert jnp.allclose(out2, ref2, atol=1e-4, rtol=1e-4), \
        "N-tiled path mismatch vs reference"

    print("KERNEL_OK")
</pallas_src>

<mosaic_0001>
module attributes {stable_mosaic.version = 11 : i64} {
  func.func @_fused_kernel(%arg0: i32, %arg1: memref<16x32xf32, #tpu.memory_space<vmem>>, %arg2: memref<32x128xbf16, #tpu.memory_space<vmem>>, %arg3: memref<1x128xf32, #tpu.memory_space<vmem>>, %arg4: memref<128x128xbf16, #tpu.memory_space<vmem>>, %arg5: memref<1x128xf32, #tpu.memory_space<vmem>>, %arg6: memref<16x128xf32, #tpu.memory_space<vmem>>) attributes {dimension_semantics = [#tpu.dimension_semantics<parallel>], iteration_bounds = array<i64: 1>, scalar_prefetch = 0 : i64, scratch_operands = 0 : i64, tpu.core_type = #tpu.core_type<tc>, window_params = [{transform_indices = @transform_0, window_bounds = array<i64: 16, 32>}, {pipeline_mode = #tpu.pipeline_mode<synchronous>, transform_indices = @transform_1, window_bounds = array<i64: 32, 128>}, {pipeline_mode = #tpu.pipeline_mode<synchronous>, transform_indices = @transform_2, window_bounds = array<i64: 1, 128>}, {pipeline_mode = #tpu.pipeline_mode<synchronous>, transform_indices = @transform_3, window_bounds = array<i64: 128, 128>}, {pipeline_mode = #tpu.pipeline_mode<synchronous>, transform_indices = @transform_4, window_bounds = array<i64: 1, 128>}, {transform_indices = @transform_5, window_bounds = array<i64: 16, 128>}]} {
    %c0 = arith.constant 0 : index
    %c0_0 = arith.constant 0 : index
    %0 = vector.load %arg1[%c0, %c0_0] : memref<16x32xf32, #tpu.memory_space<vmem>>, vector<16x32xf32>
    %1 = arith.truncf %0 : vector<16x32xf32> to vector<16x32xbf16>
    %c0_1 = arith.constant 0 : index
    %c0_2 = arith.constant 0 : index
    %2 = vector.load %arg2[%c0_1, %c0_2] : memref<32x128xbf16, #tpu.memory_space<vmem>>, vector<32x128xbf16>
    %cst = arith.constant dense<0.000000e+00> : vector<16x128xf32>
    %3 = tpu.matmul %1, %2, %cst {dimension_numbers = #tpu.dot_dimension_numbers<[1], [0], [0], [1], [0, 0, 1, 1], [], []>} : vector<16x32xbf16>, vector<32x128xbf16>, vector<16x128xf32> -> vector<16x128xf32>
    %c0_3 = arith.constant 0 : index
    %c0_4 = arith.constant 0 : index
    %4 = vector.load %arg3[%c0_3, %c0_4] : memref<1x128xf32, #tpu.memory_space<vmem>>, vector<1x128xf32>
    %5 = vector.broadcast %4 : vector<1x128xf32> to vector<16x128xf32>
    %6 = arith.addf %3, %5 : vector<16x128xf32>
    %cst_5 = arith.constant 0.000000e+00 : f32
    %7 = vector.broadcast %cst_5 : f32 to vector<16x128xf32>
    %8 = arith.maximumf %6, %7 : vector<16x128xf32>
    %9 = arith.truncf %8 : vector<16x128xf32> to vector<16x128xbf16>
    %c0_6 = arith.constant 0 : index
    %c0_7 = arith.constant 0 : index
    %10 = vector.load %arg4[%c0_6, %c0_7] : memref<128x128xbf16, #tpu.memory_space<vmem>>, vector<128x128xbf16>
    %cst_8 = arith.constant dense<0.000000e+00> : vector<16x128xf32>
    %11 = tpu.matmul %9, %10, %cst_8 {dimension_numbers = #tpu.dot_dimension_numbers<[1], [0], [0], [1], [0, 0, 1, 1], [], []>} : vector<16x128xbf16>, vector<128x128xbf16>, vector<16x128xf32> -> vector<16x128xf32>
    %c0_9 = arith.constant 0 : index
    %c0_10 = arith.constant 0 : index
    %12 = vector.load %arg5[%c0_9, %c0_10] : memref<1x128xf32, #tpu.memory_space<vmem>>, vector<1x128xf32>
    %13 = vector.broadcast %12 : vector<1x128xf32> to vector<16x128xf32>
    %14 = arith.addf %11, %13 : vector<16x128xf32>
    %cst_11 = arith.constant 0.000000e+00 : f32
    %15 = vector.broadcast %cst_11 : f32 to vector<16x128xf32>
    %16 = arith.maximumf %14, %15 : vector<16x128xf32>
    %c0_12 = arith.constant 0 : index
    %c0_13 = arith.constant 0 : index
    %17 = vector.load %arg6[%c0_12, %c0_13] : memref<16x128xf32, #tpu.memory_space<vmem>>, vector<16x128xf32>
    tpu.vector_store %arg6[%c0_12, %c0_13], %16 {strides = array<i32>} : memref<16x128xf32, #tpu.memory_space<vmem>>, vector<16x128xf32>,
    return
  }
  func.func @transform_0(%arg0: i32) -> (i32, i32) {
    %c0_i32 = arith.constant 0 : i32
    %c0_i32_0 = arith.constant 0 : i32
    return %arg0, %c0_i32 : i32, i32
  }
  func.func @transform_1(%arg0: i32) -> (i32, i32) {
    %c0_i32 = arith.constant 0 : i32
    %c0_i32_0 = arith.constant 0 : i32
    %c0_i32_1 = arith.constant 0 : i32
    return %c0_i32, %c0_i32_0 : i32, i32
  }
  func.func @transform_2(%arg0: i32) -> (i32, i32) {
    %c0_i32 = arith.constant 0 : i32
    %c0_i32_0 = arith.constant 0 : i32
    %c0_i32_1 = arith.constant 0 : i32
    return %c0_i32, %c0_i32_0 : i32, i32
  }
  func.func @transform_3(%arg0: i32) -> (i32, i32) {
    %c0_i32 = arith.constant 0 : i32
    %c0_i32_0 = arith.constant 0 : i32
    %c0_i32_1 = arith.constant 0 : i32
    return %c0_i32, %c0_i32_0 : i32, i32
  }
  func.func @transform_4(%arg0: i32) -> (i32, i32) {
    %c0_i32 = arith.constant 0 : i32
    %c0_i32_0 = arith.constant 0 : i32
    %c0_i32_1 = arith.constant 0 : i32
    return %c0_i32, %c0_i32_0 : i32, i32
  }
  func.func @transform_5(%arg0: i32) -> (i32, i32) {
    %c0_i32 = arith.constant 0 : i32
    %c0_i32_0 = arith.constant 0 : i32
    return %arg0, %c0_i32 : i32, i32
  }
}

</mosaic_0001>

<bundles_post_ra>
// kernel: tpu_custom_call.1
= control target key start
LH: loop header
LB: loop body
LE: loop exit
PB: predicated region body
PF: predicated region fallthrough
CT: control target
= control target key end

     0   :  { %10 = vsyncpa [#allocation3], 0  ;;  %s544_s0 = inlined_call_operand.hbm [shape: f32[16,32], index: 0, kind: input, shape index: {}]   ;;  %s545_s1 = inlined_call_operand.hbm [shape: bf16[32,128], index: 1, kind: input, shape index: {}]   ;;  %s546_s2 = inlined_call_operand.vmem [shape: f32[1,128], index: 2, kind: input, shape index: {}]   ;;  %s547_s3 = inlined_call_operand.hbm [shape: bf16[128,128], index: 3, kind: input, shape index: {}]   ;;  %s548_s4 = inlined_call_operand.vmem [shape: f32[1,128], index: 4, kind: input, shape index: {}]   ;;  %s549_s5 = inlined_call_operand.hbm [shape: f32[16,128], index: 5, kind: output, shape index: {}]  }
   0x1   :  { %11 = vsyncpa [#allocation6], 0 }
   0x2   :  { %12 = vsyncpa [#allocation4], 0  ;;  %s438_s18 = smov [#allocation5]   ;;  %s344_s22 = scalar_lea.hbm %s545_s1, 256 }
   0x3   :  { %s30_s19 = sshll.u32 %s438_s18, 4  ;;  %p345_p0 = scmp.ne.s32.totalorder %s545_s1, %s344_s22  ;;  %s31_s19 = int_to_ptr.vmem [resolvable:$true] %s30_s19 }
   0x4   :  { %p348_p1 = scmp.lt.u32.totalorder %s344_s22, %s545_s1 }
   0x6   :  { %p350_p2 = pnand %p348_p1, %p345_p0 }
   0x8   :  { %353 = shalt.err (!%p350_p2)
}
   0x9   :  { %s354_s27 = scalar_lea.vmem %s31_s19, 256  ;;  %p359_p4 = scmp.lt.s32.totalorder %s31_s19, %s31_s19 }
   0xa   :  { %p355_p3 = scmp.ne.s32.totalorder %s31_s19, %s354_s27  ;;  %p360_p5 = scmp.lt.s32.totalorder %s354_s27, %s354_s27 }
   0xc   :  { %p361_p6 = por %p360_p5, %p359_p4 }
   0xe   :  { %p362_p7 = pnand %p361_p6, %p355_p3 }
  0x10   :  { %365 = shalt.err (!%p362_p7)
}
  0x11   :  { %s439_s28 = smov 64   ;;  %s440_s29 = smov 4  }
  0x12   :  { %36 = dma.hbm_to_vmem [thread:$0]  %s545_s1, 256, %s31_s19, [#allocation6], %s439_s28, %s439_s28, %s440_s29  }
  0x13   :  { %s441_s7 = smov [#allocation2]   ;;  %s366_s11 = scalar_lea.hbm %s544_s0, 256 }
  0x14   :  { %s18_s8 = sshll.u32 %s441_s7, 4  ;;  %p367_p8 = scmp.ne.s32.totalorder %s544_s0, %s366_s11  ;;  %s19_s8 = int_to_ptr.vmem [resolvable:$true] %s18_s8 }
  0x15   :  { %p370_p9 = scmp.lt.u32.totalorder %s366_s11, %s544_s0 }
  0x17   :  { %p372_p10 = pnand %p370_p9, %p367_p8 }
  0x19   :  { %375 = shalt.err (!%p372_p10)
}
  0x1a   :  { %s376_s16 = scalar_lea.vmem %s19_s8, 256  ;;  %p381_p12 = scmp.lt.s32.totalorder %s19_s8, %s19_s8 }
  0x1b   :  { %p377_p11 = scmp.ne.s32.totalorder %s19_s8, %s376_s16  ;;  %p382_p13 = scmp.lt.s32.totalorder %s376_s16, %s376_s16 }
  0x1d   :  { %p383_p0 = por %p382_p13, %p381_p12 }
  0x1f   :  { %p384_p1 = pnand %p383_p0, %p377_p11 }
  0x21   :  { %387 = shalt.err (!%p384_p1)
}
  0x22   :  { %s442_s1 = smov 128   ;;  %s443_s17 = smov 8  }
  0x23   :  { %24 = dma.hbm_to_vmem [thread:$0]  %s544_s0, 256, %s19_s8, [#allocation3], %s442_s1, %s442_s1, %s443_s17  }
  0x24   :  { %s444_s20 = smov [#allocation7]   ;;  %s388_s24 = scalar_lea.hbm %s547_s3, 1024 }
  0x25   :  { %s44_s21 = sshll.u32 %s444_s20, 4  ;;  %p389_p2 = scmp.ne.s32.totalorder %s547_s3, %s388_s24  ;;  %s45_s21 = int_to_ptr.vmem [resolvable:$true] %s44_s21 }
  0x26   :  { %p392_p3 = scmp.lt.u32.totalorder %s388_s24, %s547_s3 }
  0x28   :  { %p394_p4 = pnand %p392_p3, %p389_p2 }
  0x2a   :  { %397 = shalt.err (!%p394_p4)
}
  0x2b   :  { %s398_s6 = scalar_lea.vmem %s45_s21, 1024  ;;  %p403_p6 = scmp.lt.s32.totalorder %s45_s21, %s45_s21 }
  0x2c   :  { %p399_p5 = scmp.ne.s32.totalorder %s45_s21, %s398_s6  ;;  %p404_p7 = scmp.lt.s32.totalorder %s398_s6, %s398_s6 }
  0x2e   :  { %p405_p8 = por %p404_p7, %p403_p6 }
  0x30   :  { %p406_p9 = pnand %p405_p8, %p399_p5 }
  0x32   :  { %409 = shalt.err (!%p406_p9)
}
  0x33   :  { %50 = dma.hbm_to_vmem [thread:$0]  %s547_s3, 1024, %s45_s21, [#allocation6], %s439_s28, %s439_s28, %s440_s29  }
  0x34   :  { %432 = dma.done.wait [#allocation3], 256  }
  0x35   :  { %433 = vsyncadd [#allocation3], 4294967040 }
  0x36   :  { %434 = dma.done.wait [#allocation6], 1280  }
  0x37   :  { %435 = vsyncadd [#allocation6], 4294966016  ;;  %v445_v0 = vmov 0.0   ;;  %vm446_vm0 = vmmov 0   ;;  %v334_v1 = vld [vmem:[#allocation5] sm:$0xff]   ;;  %v335_v2 = vld [vmem:[#allocation5 + $0x8] sm:$0xff]  }
  0x38   :  { %296 = vmatprep.subr.bf16.mxu0 %v445_v0  ;;  %300 = vmatprep.mubr.msk.bf16.mxu0 %vm446_vm0, %v445_v0  ;;  %v63_v3 = vld [vmem:[#allocation2] sm:$0xff]  ;;  %v64_v4 = vld [vmem:[#allocation2 + $0x8] sm:$0xff]  ;;  %vm89_vm1 = vcmask 261120   ;;  %v338_v8 = vld [vmem:[#allocation7 + $0x10] sm:$0xff]   ;;  %s447_s9 = smov [#allocation8]  }
  0x39   :  { %304 = vmatprep.subr.bf16.mxu1 %v445_v0  ;;  %320 = vmatprep.mubr.msk.bf16.mxu1 %vm446_vm0, %v445_v0  ;;  %v336_v5 = vld [vmem:[#allocation7] sm:$0xff]   ;;  %v65_v6 = vpack.c.bf16 %v64_v4, %v63_v3  ;;  %v337_v7 = vld [vmem:[#allocation7 + $0x8] sm:$0xff]   ;;  %v339_v9 = vld [vmem:[#allocation7 + $0x18] sm:$0xff]  }
  0x3a   :  { %297 = vmatpush3.bf16.msra.mxu0 %v334_v1  ;;  %305 = vmatpush3.bf16.msra.mxu1 %v336_v5  ;;  %v340_v10 = vld [vmem:[#allocation7 + $0x20] sm:$0xff]   ;;  %v341_v11 = vld [vmem:[#allocation7 + $0x28] sm:$0xff]   ;;  %v342_v12 = vld [vmem:[#allocation7 + $0x30] sm:$0xff]  }
  0x3b   :  { %298 = vmatprep.subr.bf16.mxu0 %v445_v0  ;;  %306 = vmatprep.subr.bf16.mxu1 %v445_v0  ;;  %v343_v13 = vld [vmem:[#allocation7 + $0x38] sm:$0xff]   ;;  %v271_v14 = vld [vmem:[%s546_s2] ss:$0 sm:$0xff]  ;;  %s258_s2 = sshll.u32 %s447_s9, 4  ;;  %s259_s2 = int_to_ptr.vmem [resolvable:$true] %s258_s2 }
  0x3c   :  { %v275_v24 = vld [vmem:[%s548_s4] ss:$0 sm:$0xff]  ;;  %s410_s10 = scalar_lea.vmem %s259_s2, 256  ;;  %p415_p11 = scmp.lt.s32.totalorder %s259_s2, %s259_s2 }
  0x3d   :  { %p411_p10 = scmp.ne.s32.totalorder %s259_s2, %s410_s10  ;;  %p416_p12 = scmp.lt.s32.totalorder %s410_s10, %s410_s10 }
  0x3e   :  { %299 = vmatpush3.bf16.msra.mxu0 %v335_v2  ;;  %307 = vmatpush3.bf16.msra.mxu1 %v337_v7 }
  0x3f   :  { %308 = vmatprep.subr.bf16.mxu1 %v445_v0  ;;  %p417_p13 = por %p416_p12, %p415_p11 }
  0x41   :  { %301 = vmatmul.mubr.msk.bf16.vlgmr.msra.gmra.mrb[0].mxu0 %vm89_vm1, %v65_v6  ;;  %p418_p0 = pnand %p417_p13, %p411_p10 }
  0x42   :  { %309 = vmatpush3.bf16.msra.mxu1 %v338_v8 }
  0x43   :  { %310 = vmatprep.subr.bf16.mxu1 %v445_v0 }
  0x46   :  { %311 = vmatpush3.bf16.msra.mxu1 %v339_v9 }
  0x47   :  { %312 = vmatprep.subr.bf16.mxu1 %v445_v0 }
  0x4a   :  { %313 = vmatpush3.bf16.msra.mxu1 %v340_v10 }
  0x4b   :  { %314 = vmatprep.subr.bf16.mxu1 %v445_v0 }
  0x4e   :  { %315 = vmatpush3.bf16.msra.mxu1 %v341_v11 }
  0x4f   :  { %316 = vmatprep.subr.bf16.mxu1 %v445_v0 }
  0x52   :  { %317 = vmatpush3.bf16.msra.mxu1 %v342_v12 }
  0x53   :  { %318 = vmatprep.subr.bf16.mxu1 %v445_v0 }
  0x56   :  { %319 = vmatpush3.bf16.msra.mxu1 %v343_v13 }
 0x114   :  { %v127_v15 = vpop.f32.mrb[0].mxu0 }
 0x115   :  { %v128_v16 = vadd.f32 %v271_v14, %v127_v15  ;;  %v302_v17 = vpop.f32.mrb[1].mxu0 }
 0x116   :  { %v130_v18 = vpop.f32.mrb[2].mxu0 }
 0x117   :  { %v131_v19 = vadd.f32 %v271_v14, %v130_v18  ;;  %v303_v20 = vpop.f32.mrb[3].mxu0  ;;  %v134_v21 = vmax.f32 %v128_v16, 0.0 }
 0x119   :  { %v135_v22 = vmax.f32 %v131_v19, 0.0 }
 0x11b   :  { %v136_v23 = vpack.c.bf16 %v135_v22, %v134_v21 }
 0x11d   :  { %321 = vmatmul.mubr.bf16.vlgmr.msra.gmra.mrb[0].mxu1 %v136_v23 }
 0x1f0   :  { %v242_v25 = vpop.f32.mrb[0].mxu1 }
 0x1f1   :  { %v243_v26 = vadd.f32 %v275_v24, %v242_v25  ;;  %v322_v27 = vpop.f32.mrb[1].mxu1 }
 0x1f2   :  { %v245_v28 = vpop.f32.mrb[2].mxu1 }
 0x1f3   :  { %v249_v29 = vmax.f32 %v243_v26, 0.0  ;;  %v246_v30 = vadd.f32 %v275_v24, %v245_v28  ;;  %v323_v31 = vpop.f32.mrb[3].mxu1 }
 0x1f5   :  { %251 = vst [vmem:[#allocation8] sm:$0xff] %v249_v29  ;;  %v250_v32 = vmax.f32 %v246_v30, 0.0 }
 0x1f7   :  { %252 = vst [vmem:[#allocation8 + $0x8] sm:$0xff] %v250_v32 }
 0x1f8   :  { %421 = shalt.err (!%p418_p0)
}
 0x1f9   :  { %s422_s12 = scalar_lea.hbm %s549_s5, 256 }
 0x1fa   :  { %p423_p1 = scmp.ne.s32.totalorder %s549_s5, %s422_s12  ;;  %p426_p2 = scmp.lt.u32.totalorder %s422_s12, %s549_s5 }
 0x1fc   :  { %p428_p3 = pnand %p426_p2, %p423_p1 }
 0x1fe   :  { %431 = shalt.err (!%p428_p3)
}
 0x1ff   :  { %264 = dma.vmem_to_hbm [thread:$0]  %s259_s2, 256, %s549_s5, [#allocation4], %s442_s1, %s442_s1, %s443_s17  }
 0x200   :  { %436 = dma.done.wait [#allocation4], 256  }
 0x201   :  { %437 = vsyncadd [#allocation4], 4294967040 }
 0x202   :  { %268 = vsyncpa [#allocation3], 1 }
 0x203   :  { %269 = vsyncpa [#allocation6], 1 }
 0x204   :  { %270 = vsyncpa [#allocation4], 1 }

</bundles_post_ra>
